<compile_context>
chip_gen: v6e
topology: v6e:2x2x1
jax: 0.10.0
libtpu: 0.0.40
codegen_flags: <defaults>
</compile_context>

<pallas_src>
import functools

import jax
import jax.numpy as jnp
import numpy as np
from jax.experimental import pallas as pl
from jax.experimental.pallas import tpu as pltpu


def _round_up(x, m):
    return ((x + m - 1) // m) * m


# ----------------------------- Pallas kernel ------------------------------

def _autorec_fused_kernel(vt_ref, rjt_ref, mu_ref, wvt_ref, bv_ref, out_ref,
                          acc_ref, *, tk, vt_resident):
    """Fused encode + decode, transposed layout (queries on the lane axis).

      acc (d_pad, tq) += V^T[:, k-tile] @ R[j]^T[k-tile, :]   (grid-accumulated)
      h   = sigmoid(acc + mu^T)                               (f32)
      out (1, tq) = sum_d h * W[v]^T + b[v]                   (lane-dense store)
    """
    ki = pl.program_id(1)

    @pl.when(ki == 0)
    def _():
        acc_ref[...] = jnp.zeros_like(acc_ref)

    if vt_resident:
        # V^T block is the full (d_pad, n_pad) array: DMA'd once (constant
        # index_map) and kept in VMEM; slice out the current k tile here.
        k0 = pl.multiple_of(ki * tk, 128)
        vt_tile = vt_ref[:, pl.ds(k0, tk)]
    else:
        vt_tile = vt_ref[...]

    acc_ref[...] += jnp.dot(vt_tile, rjt_ref[...],
                            preferred_element_type=jnp.float32)

    @pl.when(ki == pl.num_programs(1) - 1)
    def _():
        h = jax.nn.sigmoid(acc_ref[...] + mu_ref[...])           # (d_pad, tq) f32
        out_ref[...] = (jnp.sum(h * wvt_ref[...], axis=0, keepdims=True)
                        + bv_ref[...]).astype(out_ref.dtype)


def autorec_forward_fused(vt, rjt, mut, wvt, bv, *, tq, tk, vt_resident):
    """vt (d_pad, n_pad) bf16, rjt (n_pad, q_pad) bf16, mut (d_pad, 1) f32,
    wvt (d_pad, q_pad) f32, bv (1, q_pad) f32  ->  (1, q_pad) f32."""
    d_pad, n_pad = vt.shape
    _, q_pad = rjt.shape
    k_steps = n_pad // tk
    grid = (q_pad // tq, k_steps)            # reduction (k) axis last

    # --- BlockSpecs ---------------------------------------------------------
    if vt_resident:
        # Full-extent block, constant index: DMA'd once, resident across grid.
        vt_spec = pl.BlockSpec((d_pad, n_pad), lambda qi, ki: (0, 0))
    else:
        vt_spec = pl.BlockSpec((d_pad, tk), lambda qi, ki: (0, ki))

    # R[j]^T is the dominant per-step DMA; use a third buffer only when the
    # k reduction is deep enough for extra pipelining depth to matter.
    rjt_bufs = 2
    rjt_kwargs = {}
    if (not vt_resident) and k_steps >= 3:
        rjt_kwargs = dict(pipeline_mode=pl.Buffered(3))
        rjt_bufs = 3
    rjt_spec = pl.BlockSpec((tk, tq), lambda qi, ki: (ki, qi), **rjt_kwargs)

    # --- explicit VMEM budget (conservative; <= 48 MiB for v7x's 64 MiB) ----
    vmem_need = (
        2 * d_pad * (n_pad if vt_resident else tk) * 2      # V^T buffers (bf16)
        + rjt_bufs * tk * tq * 2                            # R[j]^T buffers (bf16)
        + 2 * d_pad * tq * 4                                # W[v]^T buffers (f32)
        + 2 * d_pad * 128 * 4                               # mu^T (lane-padded)
        + 4 * tq * 4                                        # b[v] + out buffers
        + d_pad * tq * 4                                    # f32 accumulator
    )
    vmem_limit = min(48 * 1024 * 1024,
                     max(32 * 1024 * 1024, int(vmem_need * 5 // 4)))

    # Bytes reflect the actual V^T streaming policy (once if resident,
    # once per query tile otherwise).
    vt_passes = 1 if vt_resident else (q_pad // tq)
    cost = pl.CostEstimate(
        flops=2 * d_pad * n_pad * q_pad + 3 * d_pad * q_pad,
        transcendentals=d_pad * q_pad,
        bytes_accessed=(vt_passes * d_pad * n_pad * 2        # V^T
                        + n_pad * q_pad * 2                  # R[j]^T
                        + d_pad * q_pad * 4                  # W[v]^T
                        + d_pad * 4 + 2 * q_pad * 4),        # mu, b, out
    )

    kernel = functools.partial(_autorec_fused_kernel, tk=tk,
                               vt_resident=vt_resident)

    return pl.pallas_call(
        kernel,
        out_shape=jax.ShapeDtypeStruct((1, q_pad), jnp.float32),
        grid=grid,
        in_specs=[
            vt_spec,                                              # V^T
            rjt_spec,                                             # R[j]^T
            pl.BlockSpec((d_pad, 1), lambda qi, ki: (0, 0)),      # mu^T
            pl.BlockSpec((d_pad, tq), lambda qi, ki: (0, qi)),    # W[v]^T
            pl.BlockSpec((1, tq), lambda qi, ki: (0, qi)),        # b[v]
        ],
        out_specs=pl.BlockSpec((1, tq), lambda qi, ki: (0, qi)),
        scratch_shapes=[pltpu.VMEM((d_pad, tq), jnp.float32)],    # f32 accumulator
        compiler_params=pltpu.CompilerParams(
            dimension_semantics=("parallel", "arbitrary"),
            vmem_limit_bytes=vmem_limit,
        ),
        cost_estimate=cost,
    )(vt, rjt, mut, wvt, bv)


# ----------------------------- AutoRec module -----------------------------

class AutoRecPallas:
    """h = g(spmm([i, u], r, m, V) + mu);  out = <h[j], W[v]> + b[v]  (g = sigmoid)."""

    # V^T stays VMEM-resident across the whole grid when it fits this budget
    # (kept small so resident V^T + double-buffered tiles stay well under
    # v7x's 64 MiB physical VMEM).
    _VT_RESIDENT_BUDGET = 8 * 1024 * 1024

    def __init__(self, n, d, key, *, vt_resident_budget_bytes=_VT_RESIDENT_BUDGET):
        kv, kw = jax.random.split(key)
        self.n, self.d = n, d
        self.v = 0.001 * jax.random.normal(kv, (n, d), jnp.float32)
        self.mu = jnp.zeros((1, d), jnp.float32)
        self.w = 0.001 * jax.random.normal(kw, (n, d), jnp.float32)
        self.b = jnp.zeros((n,), jnp.float32)
        # g = sigmoid is baked into the kernel; f is unused by the reference forward.

        # Hidden dim padded only to bf16 sublane granularity (16), not 128.
        self.d_pad = _round_up(d, 16)
        # Item (k) axis: large tiles for this memory-bound kernel (amortize the
        # ~0.35 us per-grid-step overhead, long contiguous DMAs, fewer acc RMWs).
        n_lane = _round_up(n, 128)
        self.tk = min(2048, n_lane)
        self.n_pad = _round_up(n_lane, self.tk)
        self.vt_resident = (self.d_pad * self.n_pad * 2) <= vt_resident_budget_bytes

        # Precompute padded / transposed parameter slabs once.  Zero-padded
        # hidden rows are multiplied by zero-padded W, so they never affect
        # results (only work, which the tight d_pad now minimizes).
        self.vt_pad = (
            jnp.zeros((self.d_pad, self.n_pad), jnp.bfloat16)
            .at[:d, :n].set(self.v.T.astype(jnp.bfloat16))
        )
        self.mut_pad = (
            jnp.zeros((self.d_pad, 1), jnp.float32).at[:d, :].set(self.mu.T)
        )

    def forward(self, u, i, r, m, v, j, s=None):
        n, d = self.n, self.d
        q = j.shape[0]

        # Query tile: lane width up to 512, and >=2 qi blocks whenever q allows
        # so the "parallel" qi axis can be split across v7x's two TensorCores.
        q128 = _round_up(q, 128)
        if q128 <= 128:
            tq = 128
        else:
            tq = max(128, min(512, (q128 // 2 // 128) * 128))
        q_pad = _round_up(q, tq)

        # ---- XLA glue: COO scatter (f32), column gather, padding -----------
        # Scatter directly into the transposed (item-major) layout the kernel
        # consumes, in f32 (duplicate COO entries accumulate exactly), then cast
        # once to bf16.
        # TODO(synk): replace the O(n*m) dense scatter with a true O(nnz*d)
        # spmm (gather-accumulate) kernel for very large user counts.
        rt_dense = jnp.zeros((self.n_pad, m), jnp.float32).at[u, i].add(r)
        rjt = (
            jnp.zeros((self.n_pad, q_pad), jnp.bfloat16)
            .at[:, :q].set(jnp.take(rt_dense, j, axis=1).astype(jnp.bfloat16))
        )
        wvt = jnp.zeros((self.d_pad, q_pad), jnp.float32).at[:d, :q].set(
            jnp.take(self.w, v, axis=0).T)
        bv = jnp.zeros((1, q_pad), jnp.float32).at[0, :q].set(jnp.take(self.b, v))

        out = autorec_forward_fused(self.vt_pad, rjt, self.mut_pad, wvt, bv,
                                    tq=tq, tk=self.tk,
                                    vt_resident=self.vt_resident)[0, :q]
        if s is not None:
            # TODO(synk): MF.decode's exact use of `s` is undefined in the reference.
            out = out * s
        return out


# ----------------------------- reference & test ----------------------------

def autorec_reference(model, u, i, r, m, v, j):
    r_dense = jnp.zeros((m, model.n), jnp.float32).at[i, u].add(r)
    h = jax.nn.sigmoid(r_dense @ model.v + model.mu)
    return jnp.sum(jnp.take(h, j, axis=0) * jnp.take(model.w, v, axis=0), axis=-1) \
        + jnp.take(model.b, v)


def _run_case(key, n_items, d_hidden, m_users, nnz, q, *, force_tiled=False):
    k_model, k_i, k_u, k_r, k_j, k_v = jax.random.split(key, 6)
    budget = 0 if force_tiled else AutoRecPallas._VT_RESIDENT_BUDGET
    model = AutoRecPallas(n_items, d_hidden, k_model,
                          vt_resident_budget_bytes=budget)

    i_idx = jax.random.randint(k_i, (nnz,), 0, m_users)              # row (user) idx
    u_idx = jax.random.randint(k_u, (nnz,), 0, n_items)              # col (item) idx
    r_val = jax.random.uniform(k_r, (nnz,), jnp.float32, 1.0, 5.0)   # ratings
    j_idx = jax.random.randint(k_j, (q,), 0, m_users)                # query users
    v_idx = jax.random.randint(k_v, (q,), 0, n_items)                # query items

    out = model.forward(u_idx, i_idx, r_val, m_users, v_idx, j_idx)
    jax.block_until_ready(out)
    assert out.shape == (q,) and out.dtype == jnp.float32

    ref = autorec_reference(model, u_idx, i_idx, r_val, m_users, v_idx, j_idx)
    # bf16 streaming of R / V is an intentional inference-precision choice.
    np.testing.assert_allclose(np.asarray(out), np.asarray(ref),
                               rtol=5e-2, atol=1e-3)


if __name__ == "__main__":
    key = jax.random.PRNGKey(0)
    k1, k2, k3 = jax.random.split(key, 3)

    # tiny case (original toy sizes): single-tile grid, resident V^T
    _run_case(k1, n_items=32, d_hidden=16, m_users=8, nnz=64, q=16)

    # multiple qi (query) blocks + finalize per tile, resident V^T
    _run_case(k2, n_items=640, d_hidden=32, m_users=64, nnz=1024, q=200)

    # tiled V^T fallback path with a real multi-step k reduction (grid = (3, 2))
    _run_case(k3, n_items=4096, d_hidden=32, m_users=256, nnz=8192, q=600,
              force_tiled=True)

    print("KERNEL_OK")
</pallas_src>

<mosaic_0001>
module attributes {stable_mosaic.version = 11 : i64} {
  func.func @_autorec_fused_kernel(%arg0: i32, %arg1: i32, %arg2: memref<16x128xbf16, #tpu.memory_space<vmem>>, %arg3: memref<128x128xbf16, #tpu.memory_space<vmem>>, %arg4: memref<16x1xf32, #tpu.memory_space<vmem>>, %arg5: memref<16x128xf32, #tpu.memory_space<vmem>>, %arg6: memref<1x128xf32, #tpu.memory_space<vmem>>, %arg7: memref<1x128xf32, #tpu.memory_space<vmem>>, %arg8: memref<16x128xf32, #tpu.memory_space<vmem>>) attributes {dimension_semantics = [#tpu.dimension_semantics<parallel>, #tpu.dimension_semantics<arbitrary>], iteration_bounds = array<i64: 1, 1>, scalar_prefetch = 0 : i64, scratch_operands = 1 : i64, tpu.core_type = #tpu.core_type<tc>, window_params = [{pipeline_mode = #tpu.pipeline_mode<synchronous>, transform_indices = @transform_0, window_bounds = array<i64: 16, 128>}, {transform_indices = @transform_1, window_bounds = array<i64: 128, 128>}, {pipeline_mode = #tpu.pipeline_mode<synchronous>, transform_indices = @transform_2, window_bounds = array<i64: 16, 1>}, {transform_indices = @transform_3, window_bounds = array<i64: 16, 128>}, {transform_indices = @transform_4, window_bounds = array<i64: 1, 128>}, {transform_indices = @transform_5, window_bounds = array<i64: 1, 128>}]} {
    %c0_i32 = arith.constant 0 : i32
    %0 = arith.cmpi eq, %arg1, %c0_i32 : i32
    %1 = arith.extui %0 : i1 to i32
    %c0_i32_0 = arith.constant 0 : i32
    %2 = arith.cmpi ne, %1, %c0_i32_0 : i32
    scf.if %2 {
      %cst_9 = arith.constant 0.000000e+00 : f32
      %15 = vector.broadcast %cst_9 : f32 to vector<16x128xf32>
      %c0_10 = arith.constant 0 : index
      %c0_11 = arith.constant 0 : index
      %16 = vector.load %arg8[%c0_10, %c0_11] : memref<16x128xf32, #tpu.memory_space<vmem>>, vector<16x128xf32>
      tpu.vector_store %arg8[%c0_10, %c0_11], %15 {strides = array<i32>} : memref<16x128xf32, #tpu.memory_space<vmem>>, vector<16x128xf32>,
    } else {
    }
    %c128_i32 = arith.constant 128 : i32
    %3 = arith.muli %arg1, %c128_i32 : i32
    %4 = tpu.assume_multiple %3, 128 : i32
    %c0 = arith.constant 0 : index
    %5 = arith.index_cast %4 : i32 to index
    %6 = vector.load %arg2[%c0, %5] : memref<16x128xbf16, #tpu.memory_space<vmem>>, vector<16x128xbf16>
    %c0_1 = arith.constant 0 : index
    %c0_2 = arith.constant 0 : index
    %7 = vector.load %arg8[%c0_1, %c0_2] : memref<16x128xf32, #tpu.memory_space<vmem>>, vector<16x128xf32>
    %c0_3 = arith.constant 0 : index
    %c0_4 = arith.constant 0 : index
    %8 = vector.load %arg3[%c0_3, %c0_4] : memref<128x128xbf16, #tpu.memory_space<vmem>>, vector<128x128xbf16>
    %cst = arith.constant dense<0.000000e+00> : vector<16x128xf32>
    %9 = tpu.matmul %6, %8, %cst {dimension_numbers = #tpu.dot_dimension_numbers<[1], [0], [0], [1], [0, 0, 1, 1], [], []>} : vector<16x128xbf16>, vector<128x128xbf16>, vector<16x128xf32> -> vector<16x128xf32>
    %10 = arith.addf %7, %9 : vector<16x128xf32>
    %c0_5 = arith.constant 0 : index
    %c0_6 = arith.constant 0 : index
    %11 = vector.load %arg8[%c0_5, %c0_6] : memref<16x128xf32, #tpu.memory_space<vmem>>, vector<16x128xf32>
    tpu.vector_store %arg8[%c0_5, %c0_6], %10 {strides = array<i32>} : memref<16x128xf32, #tpu.memory_space<vmem>>, vector<16x128xf32>,
    %c0_i32_7 = arith.constant 0 : i32
    %12 = arith.cmpi eq, %arg1, %c0_i32_7 : i32
    %13 = arith.extui %12 : i1 to i32
    %c0_i32_8 = arith.constant 0 : i32
    %14 = arith.cmpi ne, %13, %c0_i32_8 : i32
    scf.if %14 {
      %c0_9 = arith.constant 0 : index
      %c0_10 = arith.constant 0 : index
      %15 = vector.load %arg8[%c0_9, %c0_10] : memref<16x128xf32, #tpu.memory_space<vmem>>, vector<16x128xf32>
      %c0_11 = arith.constant 0 : index
      %c0_12 = arith.constant 0 : index
      %16 = vector.load %arg4[%c0_11, %c0_12] : memref<16x1xf32, #tpu.memory_space<vmem>>, vector<16x1xf32>
      %17 = vector.broadcast %16 : vector<16x1xf32> to vector<16x128xf32>
      %18 = arith.addf %15, %17 : vector<16x128xf32>
      %19 = arith.negf %18 : vector<16x128xf32>
      %20 = math.exp %19 : vector<16x128xf32>
      %cst_13 = arith.constant 1.000000e+00 : f32
      %21 = vector.broadcast %cst_13 : f32 to vector<16x128xf32>
      %22 = arith.addf %21, %20 : vector<16x128xf32>
      %23 = arith.divf %21, %22 : vector<16x128xf32>
      %c0_14 = arith.constant 0 : index
      %c0_15 = arith.constant 0 : index
      %24 = vector.load %arg5[%c0_14, %c0_15] : memref<16x128xf32, #tpu.memory_space<vmem>>, vector<16x128xf32>
      %25 = arith.mulf %23, %24 : vector<16x128xf32>
      %cst_16 = arith.constant dense<0.000000e+00> : vector<128xf32>
      %26 = vector.multi_reduction <add>, %25, %cst_16 [0] : vector<16x128xf32> to vector<128xf32>
      %27 = vector.shape_cast %26 : vector<128xf32> to vector<1x128xf32>
      %c0_17 = arith.constant 0 : index
      %c0_18 = arith.constant 0 : index
      %28 = vector.load %arg6[%c0_17, %c0_18] : memref<1x128xf32, #tpu.memory_space<vmem>>, vector<1x128xf32>
      %29 = arith.addf %27, %28 : vector<1x128xf32>
      %c0_19 = arith.constant 0 : index
      %c0_20 = arith.constant 0 : index
      %30 = vector.load %arg7[%c0_19, %c0_20] : memref<1x128xf32, #tpu.memory_space<vmem>>, vector<1x128xf32>
      tpu.vector_store %arg7[%c0_19, %c0_20], %29 {strides = array<i32>} : memref<1x128xf32, #tpu.memory_space<vmem>>, vector<1x128xf32>,
    } else {
    }
    return
  }
  func.func @transform_0(%arg0: i32, %arg1: i32) -> (i32, i32) {
    %c0_i32 = arith.constant 0 : i32
    %c0_i32_0 = arith.constant 0 : i32
    %c0_i32_1 = arith.constant 0 : i32
    return %c0_i32, %c0_i32_0 : i32, i32
  }
  func.func @transform_1(%arg0: i32, %arg1: i32) -> (i32, i32) {
    %c0_i32 = arith.constant 0 : i32
    return %arg1, %arg0 : i32, i32
  }
  func.func @transform_2(%arg0: i32, %arg1: i32) -> (i32, i32) {
    %c0_i32 = arith.constant 0 : i32
    %c0_i32_0 = arith.constant 0 : i32
    %c0_i32_1 = arith.constant 0 : i32
    return %c0_i32, %c0_i32_0 : i32, i32
  }
  func.func @transform_3(%arg0: i32, %arg1: i32) -> (i32, i32) {
    %c0_i32 = arith.constant 0 : i32
    %c0_i32_0 = arith.constant 0 : i32
    return %c0_i32, %arg0 : i32, i32
  }
  func.func @transform_4(%arg0: i32, %arg1: i32) -> (i32, i32) {
    %c0_i32 = arith.constant 0 : i32
    %c0_i32_0 = arith.constant 0 : i32
    return %c0_i32, %arg0 : i32, i32
  }
  func.func @transform_5(%arg0: i32, %arg1: i32) -> (i32, i32) {
    %c0_i32 = arith.constant 0 : i32
    %c0_i32_0 = arith.constant 0 : i32
    return %c0_i32, %arg0 : i32, i32
  }
}

</mosaic_0001>

<bundles_post_ra>
// kernel: tpu_custom_call.1
= control target key start
LH: loop header
LB: loop body
LE: loop exit
PB: predicated region body
PF: predicated region fallthrough
CT: control target
= control target key end

     0   :  { %10 = vsyncpa [#allocation4], 0  ;;  %s437_s0 = inlined_call_operand.hbm [shape: bf16[16,128], index: 0, kind: input, shape index: {}]   ;;  %s438_s1 = inlined_call_operand.hbm [shape: bf16[128,128], index: 1, kind: input, shape index: {}]   ;;  %s439_s2 = inlined_call_operand.vmem [shape: f32[16,1], index: 2, kind: input, shape index: {}]   ;;  %s440_s3 = inlined_call_operand.vmem [shape: f32[16,128], index: 3, kind: input, shape index: {}]   ;;  %s441_s4 = inlined_call_operand.vmem [shape: f32[1,128], index: 4, kind: input, shape index: {}]   ;;  %s442_s5 = inlined_call_operand.hbm [shape: f32[1,128], index: 5, kind: output, shape index: {}]  }
   0x1   :  { %11 = vsyncpa [#allocation7], 0 }
   0x2   :  { %12 = vsyncpa [#allocation5], 0  ;;  %s375_s18 = smov [#allocation3]  }
   0x3   :  { %s18_s19 = sshll.u32 %s375_s18, 4  ;;  %s19_s19 = int_to_ptr.vmem [resolvable:$true] %s18_s19 }
   0x4   :  { %s317_s20 = scalar_lea.vmem %s19_s19, 128  ;;  %p322_p1 = scmp.lt.s32.totalorder %s19_s19, %s19_s19 }
   0x5   :  { %p318_p0 = scmp.ne.s32.totalorder %s19_s19, %s317_s20  ;;  %p323_p2 = scmp.lt.s32.totalorder %s317_s20, %s317_s20 }
   0x7   :  { %p324_p3 = por %p323_p2, %p322_p1 }
   0x9   :  { %p325_p4 = pnand %p324_p3, %p318_p0 }
   0xb   :  { %328 = shalt.err (!%p325_p4)
}
   0xc   :  { %s376_s21 = smov 64   ;;  %s377_s22 = smov 4  }
   0xd   :  { %24 = dma.hbm_to_vmem [thread:$0]  %s437_s0, 128, %s19_s19, [#allocation4], %s376_s21, %s376_s21, %s377_s22  }
   0xe   :  { %s378_s25 = smov [#allocation6]  }
   0xf   :  { %s30_s26 = sshll.u32 %s378_s25, 4  ;;  %s31_s26 = int_to_ptr.vmem [resolvable:$true] %s30_s26 }
  0x10   :  { %s337_s27 = scalar_lea.vmem %s31_s26, 1024  ;;  %p342_p6 = scmp.lt.s32.totalorder %s31_s26, %s31_s26 }
  0x11   :  { %p338_p5 = scmp.ne.s32.totalorder %s31_s26, %s337_s27  ;;  %p343_p7 = scmp.lt.s32.totalorder %s337_s27, %s337_s27 }
  0x13   :  { %p344_p8 = por %p343_p7, %p342_p6 }
  0x15   :  { %p345_p9 = pnand %p344_p8, %p338_p5 }
  0x17   :  { %348 = shalt.err (!%p345_p9)
}
  0x18   :  { %36 = dma.hbm_to_vmem [thread:$0]  %s438_s1, 1024, %s31_s26, [#allocation7], %s376_s21, %s376_s21, %s377_s22  }
  0x19   :  { %369 = dma.done.wait [#allocation4], 128  }
  0x1a   :  { %370 = vsyncadd [#allocation4], 4294967168 }
  0x1b   :  { %371 = dma.done.wait [#allocation7], 1024  }
  0x1c   :  { %372 = vsyncadd [#allocation7], 4294966272  ;;  %v379_v0 = vmov 0.0   ;;  %vm380_vm0 = vmmov 0   ;;  %v381_v1 = vmov 0   ;;  %v292_v2 = vld [vmem:[#allocation6 + $0x38] sm:$0xff]  }
  0x1d   :  { %263 = vmatprep.subr.bf16.mxu0 %v379_v0  ;;  %279 = vmatprep.mubr.msk.bf16.mxu0 %vm380_vm0, %v379_v0  ;;  %v293_v3 = vld [vmem:[#allocation6 + $0x30] sm:$0xff]   ;;  %v294_v4 = vld [vmem:[#allocation6 + $0x28] sm:$0xff]   ;;  %v185_v5 = vld [vmem:[%s439_s2] sm:$0xff]  ;;  %s382_s12 = smov [#allocation8]  }
  0x1e   :  { %291 = vset.pattern.permute.xlu0 %v381_v1  ;;  %264 = vmatpush3.bf16.msra.mxu0 %v292_v2  ;;  %v295_v6 = vld [vmem:[#allocation6 + $0x20] sm:$0xff]   ;;  %v296_v8 = vld [vmem:[#allocation6 + $0x18] sm:$0xff]   ;;  %v297_v9 = vld [vmem:[#allocation6 + $0x10] sm:$0xff]   ;;  %s231_s13 = sshll.u32 %s382_s12, 4  ;;  %s232_s13 = int_to_ptr.vmem [resolvable:$true] %s231_s13 }
  0x1f   :  { %265 = vmatprep.subr.bf16.mxu0 %v379_v0  ;;  %189 = vperm.xlu0 %291, %v185_v5   ;;  %v186_v7 = vld [vmem:[%s439_s2 + $0x8] sm:$0xff]  ;;  %v298_v10 = vld [vmem:[#allocation6 + $0x8] sm:$0xff]   ;;  %v300_v12 = vld [vmem:[#allocation3] sm:$0xff]   ;;  %s353_s14 = scalar_lea.vmem %s232_s13, 32  ;;  %p354_p11 = scmp.lt.s32.totalorder %s232_s13, %s232_s13 }
  0x20   :  { %v299_v11 = vld [vmem:[#allocation6] sm:$0xff]   ;;  %v211_v28 = vld [vmem:[%s440_s3] sm:$0xff] }
  0x21   :  { %v212_v29 = vld [vmem:[%s440_s3 + $0x8] sm:$0xff]  ;;  %v222_v39 = vld [vmem:[%s441_s4] sm:$0x1]  ;;  %s349_s3 = scalar_lea.vmem %s232_s13, 16 }
  0x22   :  { %266 = vmatpush3.bf16.msra.mxu0 %v293_v3  ;;  %p350_p10 = scmp.ne.s32.totalorder %s232_s13, %s349_s3  ;;  %p355_p12 = scmp.lt.s32.totalorder %s353_s14, %s349_s3 }
  0x23   :  { %267 = vmatprep.subr.bf16.mxu0 %v379_v0  ;;  %194 = vperm.xlu0 %291, %v186_v7  }
  0x24   :  { %p356_p13 = por %p355_p12, %p354_p11 }
  0x26   :  { %268 = vmatpush3.bf16.msra.mxu0 %v294_v4  ;;  %p357_p0 = pnand %p356_p13, %p350_p10 }
  0x27   :  { %269 = vmatprep.subr.bf16.mxu0 %v379_v0 }
  0x2a   :  { %270 = vmatpush3.bf16.msra.mxu0 %v295_v6 }
  0x2b   :  { %271 = vmatprep.subr.bf16.mxu0 %v379_v0 }
  0x2e   :  { %272 = vmatpush3.bf16.msra.mxu0 %v296_v8 }
  0x2f   :  { %273 = vmatprep.subr.bf16.mxu0 %v379_v0 }
  0x32   :  { %274 = vmatpush3.bf16.msra.mxu0 %v297_v9 }
  0x33   :  { %275 = vmatprep.subr.bf16.mxu0 %v379_v0 }
  0x36   :  { %276 = vmatpush3.bf16.msra.mxu0 %v298_v10 }
  0x37   :  { %277 = vmatprep.subr.bf16.mxu0 %v379_v0 }
  0x3a   :  { %278 = vmatpush3.bf16.msra.mxu0 %v299_v11 }
  0x3d   :  { %280 = vmatmul.mubr.bf16.vlgmr.msra.gmra.mxu0 %v300_v12 }
  0x9a   :  { %v190_v13 = vpop.permute.xlu0 %189 }
  0x9e   :  { %v195_v18 = vpop.permute.xlu0 %194 }
  0xfd   :  { %v169_v14 = vpop.f32.mrf.mxu0 }
  0xfe   :  { %v197_v15 = vadd.f32 %v190_v13, %v169_v14 }
  0xff   :  { %v281_v16 = vpop.f32.mrf.mxu0 }
 0x100   :  { %v252_v17 = vmul.f32 -1.442695, %v197_v15 }
 0x101   :  { %v172_v19 = vpop.f32.mrf.mxu0 }
 0x102   :  { %301 = vpow2.f32 %v252_v17  ;;  %v198_v20 = vadd.f32 %v195_v18, %v172_v19 }
 0x103   :  { %v282_v21 = vpop.f32.mrf.mxu0 }
 0x104   :  { %v253_v22 = vmul.f32 -1.442695, %v198_v20 }
 0x106   :  { %303 = vpow2.f32 %v253_v22 }
 0x10f   :  { %v302_v23 = vpop.eup %301 }
 0x110   :  { %v205_v24 = vadd.f32 1.0, %v302_v23 }
 0x112   :  { %305 = vrcp.f32 %v205_v24 }
 0x113   :  { %v304_v25 = vpop.eup %303 }
 0x114   :  { %v206_v26 = vadd.f32 1.0, %v304_v25 }
 0x116   :  { %307 = vrcp.f32 %v206_v26 }
 0x11f   :  { %v306_v27 = vpop.eup %305 }
 0x120   :  { %v213_v31 = vmul.f32 %v306_v27, %v211_v28 }
 0x123   :  { %v308_v30 = vpop.eup %307 }
 0x124   :  { %v214_v32 = vmul.f32 %v308_v30, %v212_v29 }
 0x126   :  { %v215_v33 = vadd.f32 %v214_v32, %v213_v31 }
 0x128   :  { %v216_v34 = vrot.slane %v215_v33, 4 }
 0x12a   :  { %v217_v35 = vadd.f32 %v216_v34, %v215_v33 }
 0x12c   :  { %v218_v36 = vrot.slane %v217_v35, 2 }
 0x12e   :  { %v219_v37 = vadd.f32 %v218_v36, %v217_v35 }
 0x130   :  { %v220_v38 = vrot.slane %v219_v37, 1 }
 0x132   :  { %v221_v40 = vadd.f32 %v220_v38, %v219_v37 }
 0x134   :  { %v223_v41 = vadd.f32 %v222_v39, %v221_v40 }
 0x136   :  { %224 = vst [vmem:[#allocation8] sm:$0x1] %v223_v41 }
 0x137   :  { %360 = shalt.err (!%p357_p0)
}
 0x138   :  { %234 = dma.vmem_to_hbm [thread:$0]  %s232_s13, 16, %s442_s5, [#allocation5]  }
 0x139   :  { %373 = dma.done.wait [#allocation5], 16  }
 0x13a   :  { %374 = vsyncadd [#allocation5], 4294967280 }
 0x13b   :  { %238 = vsyncpa [#allocation4], 1 }
 0x13c   :  { %239 = vsyncpa [#allocation7], 1 }
 0x13d   :  { %240 = vsyncpa [#allocation5], 1 }

</bundles_post_ra>
